<compile_context>
chip_gen: v6e
topology: v6e:2x2x1
jax: 0.10.0
libtpu: 0.0.40
codegen_flags: <defaults>
</compile_context>

<pallas_src>
import numpy as np
import jax
import jax.numpy as jnp
from jax.experimental import pallas as pl
from jax.experimental.pallas import tpu as pltpu


# ----------------------------------------------------------------------------
# GELU — tanh approximation so the transcendental lands on the EUP slot.
# Constants are Python floats (weak types) so the op runs in the input dtype
# (bf16 inside the message kernel, f32 elsewhere).
# TODO(synk): switch to exact erf GELU if bitwise parity with nn.GELU() is
#             required (difference is ~1e-3 absolute).
# ----------------------------------------------------------------------------
_SQRT_2_OVER_PI = 0.7978845608028654
_GELU_C = 0.044715


def _gelu(x):
    x3 = x * x * x
    return 0.5 * x * (1.0 + jnp.tanh(_SQRT_2_OVER_PI * (x + _GELU_C * x3)))


def _round_up(x, m):
    return (x + m - 1) // m * m


# ----------------------------------------------------------------------------
# Message MLP kernel: Linear(10H,512) -> GELU -> Linear(512,256) -> GELU
#                     -> Linear(256,out)              (per edge tile)
# K of the first layer is split across the three gathered streams so the
# (E, 10H) concat never exists anywhere.  MXU operands bf16, f32 accumulate.
# Output is zero-padded to 128 lanes (lane-dense stores) and stored as bf16.
# ----------------------------------------------------------------------------
def _message_mlp_kernel(a_ref, bp_ref, bs_ref,
                        w1a_ref, w1p_ref, w1s_ref, b1_ref,
                        w2_ref, b2_ref, w3_ref, b3_ref, o_ref):
    h = (jnp.dot(a_ref[...], w1a_ref[...], preferred_element_type=jnp.float32)
         + jnp.dot(bp_ref[...], w1p_ref[...], preferred_element_type=jnp.float32)
         + jnp.dot(bs_ref[...], w1s_ref[...], preferred_element_type=jnp.float32)
         + b1_ref[...])
    h = _gelu(h.astype(jnp.bfloat16))          # bf16 GELU (2x VPU packing on v6e/v7x)
    h = jnp.dot(h, w2_ref[...], preferred_element_type=jnp.float32) + b2_ref[...]
    h = _gelu(h.astype(jnp.bfloat16))
    o = jnp.dot(h, w3_ref[...], preferred_element_type=jnp.float32) + b3_ref[...]
    o_ref[...] = o.astype(o_ref.dtype)


def message_mlp(a, bp, bs, w1a, w1p, w1s, b1, w2, b2, w3, b3, *, tile):
    """Message MLP over edges, tiled along the (already tile-padded) edge axis.

    a  : (E_pad, 4H) bf16  gathered mesh-side sincos embeddings
    bp : (E_pad, 3H) bf16  gathered grid-side sincos embeddings
    bs : (E_pad, 3H) bf16  gathered grid-side sdf embeddings
    """
    e = a.shape[0]
    assert e % tile == 0
    da, dp, ds = a.shape[1], bp.shape[1], bs.shape[1]
    d1, d2, d3 = b1.shape[1], b2.shape[1], b3.shape[1]

    return pl.pallas_call(
        _message_mlp_kernel,
        out_shape=jax.ShapeDtypeStruct((e, d3), jnp.bfloat16),
        grid_spec=pltpu.PrefetchScalarGridSpec(
            num_scalar_prefetch=0,
            grid=(e // tile,),
            in_specs=[
                pl.BlockSpec((tile, da), lambda i: (i, 0)),
                pl.BlockSpec((tile, dp), lambda i: (i, 0)),
                pl.BlockSpec((tile, ds), lambda i: (i, 0)),
                pl.BlockSpec((da, d1), lambda i: (0, 0)),
                pl.BlockSpec((dp, d1), lambda i: (0, 0)),
                pl.BlockSpec((ds, d1), lambda i: (0, 0)),
                pl.BlockSpec((1, d1), lambda i: (0, 0)),
                pl.BlockSpec((d1, d2), lambda i: (0, 0)),
                pl.BlockSpec((1, d2), lambda i: (0, 0)),
                pl.BlockSpec((d2, d3), lambda i: (0, 0)),
                pl.BlockSpec((1, d3), lambda i: (0, 0)),
            ],
            out_specs=pl.BlockSpec((tile, d3), lambda i: (i, 0)),
        ),
        compiler_params=pltpu.CompilerParams(
            dimension_semantics=("parallel",),
            # ~9 MiB used at tile=1024; 32 MiB is a safe scoped limit on
            # v5e (128 MiB phys), v6e (128 MiB) and v7x (64 MiB).
            vmem_limit_bytes=32 * 1024 * 1024),
    )(a, bp, bs, w1a, w1p, w1s, b1, w2, b2, w3, b3)


# ----------------------------------------------------------------------------
# sdf_embed MLP kernel: Linear(1,H) -> GELU -> Linear(H,3H)  (per grid tile)
# Output emitted directly in bf16 at its natural 3H width (gather table).
# ----------------------------------------------------------------------------
def _sdf_mlp_kernel(s_ref, w1_ref, b1_ref, w2_ref, b2_ref, o_ref):
    # Linear with in_features=1 == broadcasted outer product: (T,1)*(1,H)
    h = s_ref[...] * w1_ref[...] + b1_ref[...]
    h = _gelu(h)
    o = jnp.dot(h.astype(jnp.bfloat16), w2_ref[...],
                preferred_element_type=jnp.float32) + b2_ref[...]
    o_ref[...] = o.astype(o_ref.dtype)


def sdf_mlp(sdf_col, w1, b1, w2, b2, *, tile=2048):
    n = sdf_col.shape[0]
    h, d_out = w1.shape[1], w2.shape[1]
    tile = min(tile, _round_up(n, 8))
    n_pad = _round_up(n, tile)
    if n_pad != n:
        sdf_col = jnp.concatenate(
            [sdf_col, jnp.zeros((n_pad - n, 1), sdf_col.dtype)], axis=0)
    out = pl.pallas_call(
        _sdf_mlp_kernel,
        out_shape=jax.ShapeDtypeStruct((n_pad, d_out), jnp.bfloat16),
        grid_spec=pltpu.PrefetchScalarGridSpec(
            num_scalar_prefetch=0,
            grid=(n_pad // tile,),
            in_specs=[
                pl.BlockSpec((tile, 1), lambda i: (i, 0)),
                pl.BlockSpec((1, h), lambda i: (0, 0)),
                pl.BlockSpec((1, h), lambda i: (0, 0)),
                pl.BlockSpec((h, d_out), lambda i: (0, 0)),
                pl.BlockSpec((1, d_out), lambda i: (0, 0)),
            ],
            out_specs=pl.BlockSpec((tile, d_out), lambda i: (i, 0)),
        ),
        compiler_params=pltpu.CompilerParams(
            dimension_semantics=("parallel",)),
    )(sdf_col, w1, b1, w2, b2)
    # rows >= n are zero-input padding; callers only gather rows < n.
    return out


# ----------------------------------------------------------------------------
# ContinuousSincosEmbed (plain JAX glue — cheap elementwise sin/cos, XLA fuses
# it with the trailing bf16 cast into a single pass over the point table)
# ----------------------------------------------------------------------------
def continuous_sincos_embed(coords, dim, max_wavelength=10000.0):
    n, ndim = coords.shape
    ndim_padding = dim % ndim
    dim_per_ndim = (dim - ndim_padding) // ndim
    sincos_padding = dim_per_ndim % 2
    padding = ndim_padding + sincos_padding * ndim
    eff = (dim - padding) // ndim
    assert eff > 0
    omega = 1.0 / max_wavelength ** (
        np.arange(0, eff, 2, dtype=np.float32) / eff)             # (eff//2,)
    out = coords[:, :, None] * jnp.asarray(omega)[None, None, :]  # (N, ndim, eff//2)
    emb = jnp.concatenate([jnp.sin(out), jnp.cos(out)], axis=-1)  # (N, ndim, eff)
    emb = emb.reshape(n, ndim * eff)
    if padding > 0:
        emb = jnp.concatenate(
            [emb, jnp.zeros((n, padding), emb.dtype)], axis=-1)
    return emb


# ----------------------------------------------------------------------------
# Parameters (deterministic, PyTorch nn.Linear-style uniform init) + one-time
# kernel-friendly prep (split / pad / bf16 cast), hoisted out of the forward.
# ----------------------------------------------------------------------------
def _linear_init(key, fan_in, fan_out):
    kw, kb = jax.random.split(key)
    bound = 1.0 / np.sqrt(fan_in)
    w = jax.random.uniform(kw, (fan_in, fan_out), jnp.float32, -bound, bound)
    b = jax.random.uniform(kb, (1, fan_out), jnp.float32, -bound, bound)
    return w, b


def init_params(key, hidden_dim, output_dim):
    ks = jax.random.split(key, 5)
    p = {}
    p["sdf_w1"], p["sdf_b1"] = _linear_init(ks[0], 1, hidden_dim)
    p["sdf_w2"], p["sdf_b2"] = _linear_init(ks[1], hidden_dim, hidden_dim * 3)
    p["msg_w1"], p["msg_b1"] = _linear_init(ks[2], hidden_dim * 10, 512)
    p["msg_w2"], p["msg_b2"] = _linear_init(ks[3], 512, 256)
    p["msg_w3"], p["msg_b3"] = _linear_init(ks[4], 256, output_dim)
    return p


def prepare_params(raw, hidden_dim):
    """One-time weight prep: split w1 by input stream, pad w3/b3 to 128 lanes,
    cast MXU operands to bf16.  Do this once, not per forward call."""
    H = hidden_dim
    p = {}
    # sdf embed MLP
    p["sdf_w1"] = raw["sdf_w1"]                          # (1, H)   f32
    p["sdf_b1"] = raw["sdf_b1"]                          # (1, H)   f32
    p["sdf_w2"] = raw["sdf_w2"].astype(jnp.bfloat16)     # (H, 3H)  bf16
    p["sdf_b2"] = raw["sdf_b2"]                          # (1, 3H)  f32

    # message layer 1: rows of w1 match the reference concat order
    # [mesh_embed (4H) | grid_pos_embed (3H) | sdf_embed (3H)]
    w1 = raw["msg_w1"]
    p["msg_w1a"] = w1[: 4 * H].astype(jnp.bfloat16)
    p["msg_w1p"] = w1[4 * H: 7 * H].astype(jnp.bfloat16)
    p["msg_w1s"] = w1[7 * H: 10 * H].astype(jnp.bfloat16)
    p["msg_b1"] = raw["msg_b1"]
    p["msg_w2"] = raw["msg_w2"].astype(jnp.bfloat16)
    p["msg_b2"] = raw["msg_b2"]

    # last layer: zero-pad d_out (=3) to 128 lanes -> lane-dense stores
    w3, b3 = raw["msg_w3"], raw["msg_b3"]
    d_out = w3.shape[1]
    d_pad = _round_up(d_out, 128)
    if d_pad != d_out:
        w3 = jnp.concatenate(
            [w3, jnp.zeros((w3.shape[0], d_pad - d_out), w3.dtype)], axis=1)
        b3 = jnp.concatenate(
            [b3, jnp.zeros((1, d_pad - d_out), b3.dtype)], axis=1)
    p["msg_w3"] = w3.astype(jnp.bfloat16)
    p["msg_b3"] = b3
    p["msg_d_out"] = d_out                               # python int (static)
    return p


# ----------------------------------------------------------------------------
# Full forward pass (mirrors RansGinoMeshToGridSdfOg.forward)
# ----------------------------------------------------------------------------
def rans_gino_forward(params, mesh_pos, sdf, grid_pos, mesh_to_grid_edges,
                      hidden_dim, resolution, *, edge_tile=1024, grid_tile=2048):
    num_grid_points = int(np.prod(resolution))
    assert mesh_pos.ndim == 2 and grid_pos.ndim == 2
    assert mesh_to_grid_edges.ndim == 2
    assert grid_pos.shape[0] % num_grid_points == 0

    num_grid = grid_pos.shape[0]
    mesh_pos = mesh_pos / 100.0 - 1.0
    grid_pos = grid_pos / 100.0 - 1.0
    ones = jnp.ones((mesh_pos.shape[0], 1), mesh_pos.dtype)
    mesh_pos4 = jnp.concatenate([mesh_pos, ones], axis=1)

    # Embedding tables built directly in bf16 so the edge gathers move half
    # the bytes and no post-gather cast pass is needed.
    mesh_embed = continuous_sincos_embed(
        mesh_pos4, hidden_dim * 4).astype(jnp.bfloat16)                  # (M, 4H)
    grid_pos_embed = continuous_sincos_embed(
        grid_pos, hidden_dim * 3).astype(jnp.bfloat16)                   # (G, 3H)

    sdf_col = sdf.reshape(-1, 1)
    sdf_embed = sdf_mlp(sdf_col, params["sdf_w1"], params["sdf_b1"],
                        params["sdf_w2"], params["sdf_b2"],
                        tile=grid_tile)                                  # (>=G, 3H) bf16

    grid_idx = mesh_to_grid_edges[:, 0]
    mesh_idx = mesh_to_grid_edges[:, 1]

    # Pad the *index* arrays (not the gathered slabs) so the edge count is a
    # multiple of the tile; garbage-free rows, sliced off before reduction.
    e = mesh_to_grid_edges.shape[0]
    tile = min(edge_tile, _round_up(e, 8))
    e_pad = _round_up(e, tile)
    if e_pad != e:
        idx_pad = jnp.zeros((e_pad - e,), grid_idx.dtype)
        grid_idx_p = jnp.concatenate([grid_idx, idx_pad])
        mesh_idx_p = jnp.concatenate([mesh_idx, idx_pad])
    else:
        grid_idx_p, mesh_idx_p = grid_idx, mesh_idx

    # TODO(synk): the data-dependent row gather and the CSR segment-mean could
    # be fused into the message kernel via scalar-prefetched indices/offsets
    # (edges are sorted by grid index); kept in plain JAX here.
    a_gather = mesh_embed[mesh_idx_p]                                    # (E_pad, 4H) bf16
    bp_gather = grid_pos_embed[grid_idx_p]                               # (E_pad, 3H) bf16
    bs_gather = sdf_embed[grid_idx_p]                                    # (E_pad, 3H) bf16

    msg = message_mlp(a_gather, bp_gather, bs_gather,
                      params["msg_w1a"], params["msg_w1p"], params["msg_w1s"],
                      params["msg_b1"], params["msg_w2"], params["msg_b2"],
                      params["msg_w3"], params["msg_b3"],
                      tile=tile)                                         # (E_pad, 128) bf16

    d_out = params["msg_d_out"]
    x = msg[:e, :d_out].astype(jnp.float32)

    # segment mean over grid_idx (== torch_scatter.segment_csr(reduce="mean"),
    # empty segments -> 0); accumulate in f32.
    sums = jax.ops.segment_sum(x, grid_idx, num_segments=num_grid)
    counts = jax.ops.segment_sum(jnp.ones((e,), jnp.float32), grid_idx,
                                 num_segments=num_grid)
    mean = sums / jnp.maximum(counts, 1.0)[:, None]

    out = jnp.concatenate([grid_pos, sdf_col, mean], axis=1)   # (G, output_dim+4)
    out = out.reshape(-1, num_grid_points, out.shape[-1])      # (B, prod(res), out+4)
    return out


# ----------------------------------------------------------------------------
if __name__ == "__main__":
    hidden_dim = 32
    output_dim = 3                 # module output feature dim becomes output_dim + 4
    resolution = (4, 4, 4)
    num_grid_points = int(np.prod(resolution))
    batch = 2
    G = batch * num_grid_points    # 128 grid points total
    M = 48                         # mesh points
    E = 320                        # mesh->grid edges

    key = jax.random.PRNGKey(0)
    k = jax.random.split(key, 8)

    mesh_pos = jax.random.uniform(k[0], (M, 3), jnp.float32, 0.0, 200.0)
    grid_pos = jax.random.uniform(k[1], (G, 3), jnp.float32, 0.0, 200.0)
    sdf = jax.random.uniform(k[2], (G,), jnp.float32, -1.0, 1.0)
    grid_idx = jax.random.randint(k[3], (E,), 0, G, dtype=jnp.int32)
    mesh_idx = jax.random.randint(k[4], (E,), 0, M, dtype=jnp.int32)
    # segment_csr in the reference assumes edges sorted by grid index
    order = jnp.argsort(grid_idx)
    mesh_to_grid_edges = jnp.stack([grid_idx[order], mesh_idx[order]], axis=1)

    raw_params = init_params(k[5], hidden_dim, output_dim)
    params = prepare_params(raw_params, hidden_dim)   # one-time weight prep

    out = rans_gino_forward(params, mesh_pos, sdf, grid_pos,
                            mesh_to_grid_edges, hidden_dim, resolution)
    out = jax.block_until_ready(out)

    assert out.shape == (batch, num_grid_points, output_dim + 4), out.shape
    assert bool(jnp.all(jnp.isfinite(out)))
    print("KERNEL_OK")
</pallas_src>

<mosaic_0001>
module attributes {stable_mosaic.version = 11 : i64} {
  func.func @_sdf_mlp_kernel(%arg0: i32, %arg1: memref<128x1xf32, #tpu.memory_space<vmem>>, %arg2: memref<1x32xf32, #tpu.memory_space<vmem>>, %arg3: memref<1x32xf32, #tpu.memory_space<vmem>>, %arg4: memref<32x96xbf16, #tpu.memory_space<vmem>>, %arg5: memref<1x96xf32, #tpu.memory_space<vmem>>, %arg6: memref<128x96xbf16, #tpu.memory_space<vmem>>) attributes {dimension_semantics = [#tpu.dimension_semantics<parallel>], iteration_bounds = array<i64: 1>, scalar_prefetch = 0 : i64, scratch_operands = 0 : i64, tpu.core_type = #tpu.core_type<tc>, window_params = [{transform_indices = @transform_0, window_bounds = array<i64: 128, 1>}, {pipeline_mode = #tpu.pipeline_mode<synchronous>, transform_indices = @transform_1, window_bounds = array<i64: 1, 32>}, {pipeline_mode = #tpu.pipeline_mode<synchronous>, transform_indices = @transform_2, window_bounds = array<i64: 1, 32>}, {pipeline_mode = #tpu.pipeline_mode<synchronous>, transform_indices = @transform_3, window_bounds = array<i64: 32, 96>}, {pipeline_mode = #tpu.pipeline_mode<synchronous>, transform_indices = @transform_4, window_bounds = array<i64: 1, 96>}, {transform_indices = @transform_5, window_bounds = array<i64: 128, 96>}]} {
    %c0 = arith.constant 0 : index
    %c0_0 = arith.constant 0 : index
    %0 = vector.load %arg1[%c0, %c0_0] : memref<128x1xf32, #tpu.memory_space<vmem>>, vector<128x1xf32>
    %c0_1 = arith.constant 0 : index
    %c0_2 = arith.constant 0 : index
    %1 = vector.load %arg2[%c0_1, %c0_2] : memref<1x32xf32, #tpu.memory_space<vmem>>, vector<1x32xf32>
    %2 = vector.broadcast %0 : vector<128x1xf32> to vector<128x32xf32>
    %3 = vector.broadcast %1 : vector<1x32xf32> to vector<128x32xf32>
    %4 = arith.mulf %2, %3 : vector<128x32xf32>
    %c0_3 = arith.constant 0 : index
    %c0_4 = arith.constant 0 : index
    %5 = vector.load %arg3[%c0_3, %c0_4] : memref<1x32xf32, #tpu.memory_space<vmem>>, vector<1x32xf32>
    %6 = vector.broadcast %5 : vector<1x32xf32> to vector<128x32xf32>
    %7 = arith.addf %4, %6 : vector<128x32xf32>
    %8 = arith.mulf %7, %7 : vector<128x32xf32>
    %9 = arith.mulf %8, %7 : vector<128x32xf32>
    %cst = arith.constant 5.000000e-01 : f32
    %10 = vector.broadcast %cst : f32 to vector<128x32xf32>
    %11 = arith.mulf %10, %7 : vector<128x32xf32>
    %cst_5 = arith.constant 4.471500e-02 : f32
    %12 = vector.broadcast %cst_5 : f32 to vector<128x32xf32>
    %13 = arith.mulf %12, %9 : vector<128x32xf32>
    %14 = arith.addf %7, %13 : vector<128x32xf32>
    %cst_6 = arith.constant 0.797884583 : f32
    %15 = vector.broadcast %cst_6 : f32 to vector<128x32xf32>
    %16 = arith.mulf %15, %14 : vector<128x32xf32>
    %17 = math.tanh %16 : vector<128x32xf32>
    %cst_7 = arith.constant 1.000000e+00 : f32
    %18 = vector.broadcast %cst_7 : f32 to vector<128x32xf32>
    %19 = arith.addf %18, %17 : vector<128x32xf32>
    %20 = arith.mulf %11, %19 : vector<128x32xf32>
    %21 = arith.truncf %20 : vector<128x32xf32> to vector<128x32xbf16>
    %c0_8 = arith.constant 0 : index
    %c0_9 = arith.constant 0 : index
    %22 = vector.load %arg4[%c0_8, %c0_9] : memref<32x96xbf16, #tpu.memory_space<vmem>>, vector<32x96xbf16>
    %cst_10 = arith.constant dense<0.000000e+00> : vector<128x96xf32>
    %23 = tpu.matmul %21, %22, %cst_10 {dimension_numbers = #tpu.dot_dimension_numbers<[1], [0], [0], [1], [0, 0, 1, 1], [], []>} : vector<128x32xbf16>, vector<32x96xbf16>, vector<128x96xf32> -> vector<128x96xf32>
    %c0_11 = arith.constant 0 : index
    %c0_12 = arith.constant 0 : index
    %24 = vector.load %arg5[%c0_11, %c0_12] : memref<1x96xf32, #tpu.memory_space<vmem>>, vector<1x96xf32>
    %25 = vector.broadcast %24 : vector<1x96xf32> to vector<128x96xf32>
    %26 = arith.addf %23, %25 : vector<128x96xf32>
    %27 = arith.truncf %26 : vector<128x96xf32> to vector<128x96xbf16>
    %c0_13 = arith.constant 0 : index
    %c0_14 = arith.constant 0 : index
    %28 = vector.load %arg6[%c0_13, %c0_14] : memref<128x96xbf16, #tpu.memory_space<vmem>>, vector<128x96xbf16>
    tpu.vector_store %arg6[%c0_13, %c0_14], %27 {strides = array<i32>} : memref<128x96xbf16, #tpu.memory_space<vmem>>, vector<128x96xbf16>,
    return
  }
  func.func @transform_0(%arg0: i32) -> (i32, i32) {
    %c0_i32 = arith.constant 0 : i32
    %c0_i32_0 = arith.constant 0 : i32
    return %arg0, %c0_i32 : i32, i32
  }
  func.func @transform_1(%arg0: i32) -> (i32, i32) {
    %c0_i32 = arith.constant 0 : i32
    %c0_i32_0 = arith.constant 0 : i32
    %c0_i32_1 = arith.constant 0 : i32
    return %c0_i32, %c0_i32_0 : i32, i32
  }
  func.func @transform_2(%arg0: i32) -> (i32, i32) {
    %c0_i32 = arith.constant 0 : i32
    %c0_i32_0 = arith.constant 0 : i32
    %c0_i32_1 = arith.constant 0 : i32
    return %c0_i32, %c0_i32_0 : i32, i32
  }
  func.func @transform_3(%arg0: i32) -> (i32, i32) {
    %c0_i32 = arith.constant 0 : i32
    %c0_i32_0 = arith.constant 0 : i32
    %c0_i32_1 = arith.constant 0 : i32
    return %c0_i32, %c0_i32_0 : i32, i32
  }
  func.func @transform_4(%arg0: i32) -> (i32, i32) {
    %c0_i32 = arith.constant 0 : i32
    %c0_i32_0 = arith.constant 0 : i32
    %c0_i32_1 = arith.constant 0 : i32
    return %c0_i32, %c0_i32_0 : i32, i32
  }
  func.func @transform_5(%arg0: i32) -> (i32, i32) {
    %c0_i32 = arith.constant 0 : i32
    %c0_i32_0 = arith.constant 0 : i32
    return %arg0, %c0_i32 : i32, i32
  }
}

</mosaic_0001>

<bundles_post_ra>
// kernel: tpu_custom_call.1
= control target key start
LH: loop header
LB: loop body
LE: loop exit
PB: predicated region body
PF: predicated region fallthrough
CT: control target
= control target key end

     0   :  { %v661_v0 = vmov 0   ;;  %vm338_vm0 = vcmask 261120   ;;  %vm524_vm1 = vcmask 781312   ;;  %s993_s0 = inlined_call_operand.vmem [shape: f32[128,1], index: 0, kind: input, shape index: {}]   ;;  %s994_s3 = inlined_call_operand.vmem [shape: bf16[32,96], index: 3, kind: input, shape index: {}]   ;;  %s995_s1 = inlined_call_operand.vmem [shape: f32[1,32], index: 1, kind: input, shape index: {}]   ;;  %s996_s2 = inlined_call_operand.vmem [shape: f32[1,32], index: 2, kind: input, shape index: {}]   ;;  %s997_s4 = inlined_call_operand.vmem [shape: f32[1,96], index: 4, kind: input, shape index: {}]   ;;  %s998_s5 = inlined_call_operand.vmem [shape: bf16[128,96], index: 5, kind: output, shape index: {}]  }
   0x1   :  { %626 = vset.pattern.permute.xlu1 %v661_v0  ;;  %625 = vset.pattern.permute.xlu0 %v661_v0  ;;  %v29_v1 = vld [vmem:[%s993_s0 + $0x40] sm:$0xff]  ;;  %v30_v3 = vld [vmem:[%s993_s0 + $0x48] sm:$0xff]  ;;  %v24_v5 = vld [vmem:[%s993_s0 + $0x18] sm:$0xff] }
   0x2   :  { %v21_v2 = vld [vmem:[%s993_s0] sm:$0xff]  ;;  %80 = vperm.xlu1 %626, %v29_v1   ;;  %v22_v4 = vld [vmem:[%s993_s0 + $0x8] sm:$0xff]  ;;  %v23_v6 = vld [vmem:[%s993_s0 + $0x10] sm:$0xff] }
   0x3   :  { %40 = vperm.xlu0 %625, %v21_v2   ;;  %v32_v7 = vld [vmem:[%s993_s0 + $0x58] sm:$0xff]  ;;  %v31_v8 = vld [vmem:[%s993_s0 + $0x50] sm:$0xff]  ;;  %v26_v9 = vld [vmem:[%s993_s0 + $0x28] sm:$0xff] }
   0x4   :  { %v25_v10 = vld [vmem:[%s993_s0 + $0x20] sm:$0xff]  ;;  %v34_v11 = vld [vmem:[%s993_s0 + $0x68] sm:$0xff]  ;;  %v28_v13 = vld [vmem:[%s993_s0 + $0x38] sm:$0xff] }
   0x5   :  { %v33_v12 = vld [vmem:[%s993_s0 + $0x60] sm:$0xff]  ;;  %v27_v14 = vld [vmem:[%s993_s0 + $0x30] sm:$0xff]  ;;  %v36_v15 = vld [vmem:[%s993_s0 + $0x78] sm:$0xff] }
   0x6   :  { %85 = vperm.xlu1 %626, %v30_v3   ;;  %v35_v16 = vld [vmem:[%s993_s0 + $0x70] sm:$0xff]  ;;  %v627_v17 = vld [vmem:[%s994_s3 + $0x8] sm:$0xff]   ;;  %v628_v18 = vld [vmem:[%s994_s3] sm:$0xff]  }
   0x7   :  { %45 = vperm.xlu0 %625, %v22_v4   ;;  %600 = vmatprep.subr.bf16.mxu0 %v627_v17  ;;  %v749_v19 = vld [vmem:[%s995_s1] ss:$0 sm:$0xff] }
   0x8   :  { %620 = vmatprep.subr.bf16.mxu1 %v627_v17  ;;  %601 = vmatpush3.bf16.msra.mxu0 %v627_v17  ;;  %v754_v20 = vld [vmem:[%s996_s2] ss:$0 sm:$0xff] }
   0x9   :  { %622 = vmatpush3.bf16.msra.mxu1 %v627_v17  ;;  %602 = vmatprep.subr.bf16.mxu0 %v628_v18 }
   0xa   :  { %55 = vperm.xlu1 %626, %v24_v5   ;;  %621 = vmatprep.subr.bf16.mxu1 %v628_v18 }
   0xb   :  { %50 = vperm.xlu0 %625, %v23_v6  }
   0xc   :  { %603 = vmatpush3.bf16.msra.mxu0 %v628_v18 }
   0xd   :  { %623 = vmatpush3.bf16.msra.mxu1 %v628_v18 }
   0xe   :  { %95 = vperm.xlu1 %626, %v32_v7  }
   0xf   :  { %90 = vperm.xlu0 %625, %v31_v8  }
  0x12   :  { %65 = vperm.xlu1 %626, %v26_v9  }
  0x13   :  { %60 = vperm.xlu0 %625, %v25_v10  }
  0x16   :  { %105 = vperm.xlu1 %626, %v34_v11  }
  0x17   :  { %100 = vperm.xlu0 %625, %v33_v12  }
  0x1a   :  { %75 = vperm.xlu1 %626, %v28_v13  }
  0x1b   :  { %70 = vperm.xlu0 %625, %v27_v14  }
  0x1e   :  { %115 = vperm.xlu1 %626, %v36_v15  }
  0x1f   :  { %110 = vperm.xlu0 %625, %v35_v16  }
  0x7d   :  { %v81_v21 = vpop.permute.xlu1 %80 }
  0x7e   :  { %v41_v22 = vpop.permute.xlu0 %40  ;;  %v132_v23 = vmul.f32 %v749_v19, %v81_v21 }
  0x7f   :  { %v124_v24 = vmul.f32 %v749_v19, %v41_v22 }
  0x80   :  { %v762_v28 = vadd.f32 %v754_v20, %v132_v23 }
  0x81   :  { %v759_v25 = vadd.f32 %v754_v20, %v124_v24  ;;  %v86_v26 = vpop.permute.xlu1 %85 }
  0x82   :  { %v46_v27 = vpop.permute.xlu0 %45  ;;  %v133_v30 = vmul.f32 %v749_v19, %v86_v26  ;;  %v171_v37 = vmul.f32 %v762_v28, %v762_v28 }
  0x83   :  { %v163_v29 = vmul.f32 %v759_v25, %v759_v25  ;;  %v125_v31 = vmul.f32 %v749_v19, %v46_v27 }
  0x84   :  { %v770_v33 = vadd.f32 %v754_v20, %v133_v30  ;;  %v187_v47 = vmul.f32 %v171_v37, %v762_v28 }
  0x85   :  { %v179_v32 = vmul.f32 %v163_v29, %v759_v25  ;;  %v773_v34 = vadd.f32 %v754_v20, %v125_v31  ;;  %v56_v35 = vpop.permute.xlu1 %55 }
  0x86   :  { %v51_v36 = vpop.permute.xlu0 %50  ;;  %v127_v39 = vmul.f32 %v749_v19, %v56_v35  ;;  %v172_v42 = vmul.f32 %v770_v33, %v770_v33  ;;  %v219_v61 = vmul.f32 0.044715, %v187_v47 }
  0x87   :  { %v164_v38 = vmul.f32 %v773_v34, %v773_v34  ;;  %v126_v40 = vmul.f32 %v749_v19, %v51_v36  ;;  %v211_v41 = vmul.f32 0.044715, %v179_v32 }
  0x88   :  { %v784_v43 = vadd.f32 %v754_v20, %v127_v39  ;;  %v188_v53 = vmul.f32 %v172_v42, %v770_v33  ;;  %v235_v24 = vadd.f32 %v219_v61, %v762_v28 }
  0x89   :  { %v787_v44 = vadd.f32 %v754_v20, %v126_v40  ;;  %v96_v45 = vpop.permute.xlu1 %95  ;;  %v180_v48 = vmul.f32 %v164_v38, %v773_v34  ;;  %v227_v56 = vadd.f32 %v211_v41, %v759_v25 }
  0x8a   :  { %v91_v46 = vpop.permute.xlu0 %90  ;;  %v135_v49 = vmul.f32 %v749_v19, %v96_v45  ;;  %v166_v51 = vmul.f32 %v784_v43, %v784_v43  ;;  %v220_v5 = vmul.f32 0.044715, %v188_v53 }
  0x8b   :  { %v134_v50 = vmul.f32 %v749_v19, %v91_v46  ;;  %v165_v52 = vmul.f32 %v787_v44, %v787_v44  ;;  %v212_v62 = vmul.f32 0.044715, %v180_v48  ;;  %v243_v8 = vmul.f32 0.7978846, %v227_v56 }
  0x8c   :  { %v799_v54 = vadd.f32 %v754_v20, %v135_v49  ;;  %v182_v57 = vmul.f32 %v166_v51, %v784_v43  ;;  %v236_v40 = vadd.f32 %v220_v5, %v770_v33 }
  0x8d   :  { %v802_v55 = vadd.f32 %v754_v20, %v134_v50  ;;  %v181_v58 = vmul.f32 %v165_v52, %v787_v44  ;;  %v66_v59 = vpop.permute.xlu1 %65  ;;  %v228_v23 = vadd.f32 %v212_v62, %v773_v34  ;;  %629 = vtanh.f32 %v243_v8 }
  0x8e   :  { %v61_v60 = vpop.permute.xlu0 %60  ;;  %v174_v63 = vmul.f32 %v799_v54, %v799_v54  ;;  %v214_v1 = vmul.f32 0.044715, %v182_v57  ;;  %v129_v3 = vmul.f32 %v749_v19, %v66_v59 }
  0x8f   :  { %v173_v0 = vmul.f32 %v802_v55, %v802_v55  ;;  %v213_v2 = vmul.f32 0.044715, %v181_v58  ;;  %v128_v4 = vmul.f32 %v749_v19, %v61_v60  ;;  %v244_v49 = vmul.f32 0.7978846, %v228_v23 }
  0x90   :  { %v190_v6 = vmul.f32 %v174_v63, %v799_v54  ;;  %v230_v9 = vadd.f32 %v214_v1, %v784_v43  ;;  %v818_v11 = vadd.f32 %v754_v20, %v129_v3 }
  0x91   :  { %v189_v7 = vmul.f32 %v173_v0, %v802_v55  ;;  %v229_v10 = vadd.f32 %v213_v2, %v787_v44  ;;  %v821_v12 = vadd.f32 %v754_v20, %v128_v4  ;;  %v106_v13 = vpop.permute.xlu1 %105 }
  0x92   :  { %v101_v14 = vpop.permute.xlu0 %100  ;;  %v222_v15 = vmul.f32 0.044715, %v190_v6  ;;  %v137_v17 = vmul.f32 %v749_v19, %v106_v13  ;;  %v246_v21 = vmul.f32 0.7978846, %v230_v9  ;;  %v168_v22 = vmul.f32 %v818_v11, %v818_v11 }
  0x93   :  { %v221_v16 = vmul.f32 0.044715, %v189_v7  ;;  %v136_v18 = vmul.f32 %v749_v19, %v101_v14  ;;  %v245_v26 = vmul.f32 0.7978846, %v229_v10  ;;  %v167_v30 = vmul.f32 %v821_v12, %v821_v12 }
  0x94   :  { %v238_v27 = vadd.f32 %v222_v15, %v799_v54  ;;  %v184_v31 = vmul.f32 %v168_v22, %v818_v11  ;;  %v835_v32 = vadd.f32 %v754_v20, %v137_v17  ;;  %631 = vtanh.f32 %v246_v21 }
  0x95   :  { %v237_v29 = vadd.f32 %v221_v16, %v802_v55  ;;  %v838_v35 = vadd.f32 %v754_v20, %v136_v18  ;;  %v76_v36 = vpop.permute.xlu1 %75  ;;  %v183_v39 = vmul.f32 %v167_v30, %v821_v12  ;;  %633 = vtanh.f32 %v245_v26 }
  0x96   :  { %v71_v37 = vpop.permute.xlu0 %70  ;;  %v254_v38 = vmul.f32 0.7978846, %v238_v27  ;;  %v216_v42 = vmul.f32 0.044715, %v184_v31  ;;  %v176_v45 = vmul.f32 %v835_v32, %v835_v32  ;;  %v131_v48 = vmul.f32 %v749_v19, %v76_v36 }
  0x97   :  { %v253_v41 = vmul.f32 0.7978846, %v237_v29  ;;  %v175_v46 = vmul.f32 %v838_v35, %v838_v35  ;;  %v215_v47 = vmul.f32 0.044715, %v183_v39  ;;  %v130_v59 = vmul.f32 %v749_v19, %v71_v37 }
  0x98   :  { %635 = vtanh.f32 %v254_v38  ;;  %v232_v50 = vadd.f32 %v216_v42, %v818_v11  ;;  %v192_v51 = vmul.f32 %v176_v45, %v835_v32  ;;  %v852_v58 = vadd.f32 %v754_v20, %v131_v48 }
  0x99   :  { %v191_v52 = vmul.f32 %v175_v46, %v838_v35  ;;  %v116_v53 = vpop.permute.xlu1 %115  ;;  %v231_v57 = vadd.f32 %v215_v47, %v821_v12  ;;  %637 = vtanh.f32 %v253_v41  ;;  %v859_v2 = vadd.f32 %v754_v20, %v130_v59 }
  0x9a   :  { %v111_v56 = vpop.permute.xlu0 %110  ;;  %v139_v60 = vmul.f32 %v749_v19, %v116_v53  ;;  %v248_v61 = vmul.f32 0.7978846, %v232_v50  ;;  %v224_v62 = vmul.f32 0.044715, %v192_v51  ;;  %v170_v1 = vmul.f32 %v852_v58, %v852_v58  ;;  %v630_v21 = vpop.eup %629 }
  0x9b   :  { %v223_v63 = vmul.f32 0.044715, %v191_v52  ;;  %v247_v0 = vmul.f32 0.7978846, %v231_v57  ;;  %v138_v3 = vmul.f32 %v749_v19, %v111_v56  ;;  %v169_v8 = vmul.f32 %v859_v2, %v859_v2 }
  0x9c   :  { %639 = vtanh.f32 %v248_v61  ;;  %v240_v4 = vadd.f32 %v224_v62, %v835_v32  ;;  %v865_v6 = vadd.f32 %v754_v20, %v139_v60  ;;  %v186_v7 = vmul.f32 %v170_v1, %v852_v58 }
  0x9d   :  { %v239_v5 = vadd.f32 %v223_v63, %v838_v35  ;;  %641 = vtanh.f32 %v247_v0  ;;  %v251_v19 = vmul.f32 0.7978846, %v235_v24  ;;  %v185_v15 = vmul.f32 %v169_v8, %v859_v2 }
  0x9e   :  { %v256_v9 = vmul.f32 0.7978846, %v240_v4  ;;  %v178_v13 = vmul.f32 %v865_v6, %v865_v6  ;;  %v218_v14 = vmul.f32 0.044715, %v186_v7  ;;  %v874_v16 = vadd.f32 %v754_v20, %v138_v3 }
  0x9f   :  { %v255_v10 = vmul.f32 0.7978846, %v239_v5  ;;  %643 = vtanh.f32 %v244_v49  ;;  %v252_v18 = vmul.f32 0.7978846, %v236_v40  ;;  %v217_v23 = vmul.f32 0.044715, %v185_v15 }
  0xa0   :  { %645 = vtanh.f32 %v256_v9  ;;  %v194_v17 = vmul.f32 %v178_v13, %v865_v6  ;;  %v234_v22 = vadd.f32 %v218_v14, %v852_v58  ;;  %v177_v26 = vmul.f32 %v874_v16, %v874_v16 }
  0xa1   :  { %647 = vtanh.f32 %v255_v10  ;;  %v632_v24 = vpop.eup %631  ;;  %v233_v20 = vadd.f32 %v217_v23, %v859_v2  ;;  %v195_v45 = vmul.f32 0.5, %v759_v25  ;;  %v198_v49 = vmul.f32 0.5, %v784_v43 }
  0xa2   :  { %v226_v27 = vmul.f32 0.044715, %v194_v17  ;;  %649 = vtanh.f32 %v251_v19  ;;  %v250_v29 = vmul.f32 0.7978846, %v234_v22  ;;  %v193_v30 = vmul.f32 %v177_v26, %v874_v16  ;;  %v634_v31 = vpop.eup %633 }
  0xa3   :  { %651 = vtanh.f32 %v252_v18  ;;  %v249_v38 = vmul.f32 0.7978846, %v233_v20  ;;  %v277_v46 = vadd.f32 1.0, %v634_v31  ;;  %v278_v47 = vadd.f32 1.0, %v632_v24 }
  0xa4   :  { %v242_v36 = vadd.f32 %v226_v27, %v865_v6  ;;  %653 = vtanh.f32 %v250_v29  ;;  %v225_v39 = vmul.f32 0.044715, %v193_v30  ;;  %v196_v51 = vmul.f32 0.5, %v773_v34 }
  0xa5   :  { %v636_v37 = vpop.eup %635  ;;  %655 = vtanh.f32 %v249_v38  ;;  %v203_v52 = vmul.f32 0.5, %v762_v28  ;;  %v197_v56 = vmul.f32 0.5, %v787_v44  ;;  %v200_v57 = vmul.f32 0.5, %v818_v11 }
  0xa6   :  { %v258_v40 = vmul.f32 0.7978846, %v242_v36  ;;  %v638_v41 = vpop.eup %637  ;;  %v241_v42 = vadd.f32 %v225_v39, %v874_v16  ;;  %v199_v59 = vmul.f32 0.5, %v821_v12  ;;  %v275_v25 = vadd.f32 1.0, %v630_v21 }
  0xa7   :  { %v286_v61 = vadd.f32 1.0, %v636_v37  ;;  %v293_v0 = vmul.f32 %v277_v46, %v197_v56  ;;  %v294_v43 = vmul.f32 %v278_v47, %v198_v49  ;;  %v285_v1 = vadd.f32 1.0, %v638_v41 }
  0xa8   :  { %657 = vtanh.f32 %v258_v40  ;;  %v257_v50 = vmul.f32 0.7978846, %v241_v42  ;;  %v206_v28 = vmul.f32 0.5, %v799_v54  ;;  %v204_v44 = vmul.f32 0.5, %v770_v33 }
  0xa9   :  { %v640_v48 = vpop.eup %639  ;;  %v205_v12 = vmul.f32 0.5, %v802_v55  ;;  %v208_v7 = vmul.f32 0.5, %v835_v32  ;;  %v207_v8 = vmul.f32 0.5, %v838_v35  ;;  %v291_v13 = vmul.f32 %v275_v25, %v195_v45 }
  0xaa   :  { %v642_v53 = vpop.eup %641  ;;  %v280_v60 = vadd.f32 1.0, %v640_v48  ;;  %659 = vtanh.f32 %v257_v50  ;;  %v302_v14 = vmul.f32 %v286_v61, %v206_v28  ;;  %v308_v54 = vpack.c.bf16 %v294_v43, %v293_v0 }
  0xab   :  { %v279_v62 = vadd.f32 1.0, %v642_v53  ;;  %v301_v21 = vmul.f32 %v285_v1, %v205_v12  ;;  %v202_v32 = vmul.f32 0.5, %v852_v58  ;;  %v201_v30 = vmul.f32 0.5, %v859_v2 }
  0xac   :  { %v644_v63 = vpop.eup %643  ;;  %v296_v3 = vmul.f32 %v280_v60, %v200_v57  ;;  %v210_v58 = vmul.f32 0.5, %v865_v6  ;;  %v209_v2 = vmul.f32 0.5, %v874_v16  ;;  %v911_v6 = vld [vmem:[%s997_s4] ss:$0 sm:$0xff] }
  0xad   :  { %v646_v34 = vpop.eup %645  ;;  %v276_v4 = vadd.f32 1.0, %v644_v63  ;;  %v295_v5 = vmul.f32 %v279_v62, %v199_v59  ;;  %v312_v31 = vpack.c.bf16 %v302_v14, %v301_v21 }
  0xae   :  { %v648_v11 = vpop.eup %647  ;;  %v288_v9 = vadd.f32 1.0, %v646_v34 }
  0xaf   :  { %v650_v10 = vpop.eup %649  ;;  %v292_v19 = vmul.f32 %v276_v4, %v196_v51  ;;  %v287_v15 = vadd.f32 1.0, %v648_v11  ;;  %v309_v22 = vpack.c.bf16 %v296_v3, %v295_v5 }
  0xb0   :  { %v652_v17 = vpop.eup %651  ;;  %v283_v18 = vadd.f32 1.0, %v650_v10  ;;  %v304_v24 = vmul.f32 %v288_v9, %v208_v7 }
  0xb1   :  { %v307_v33 = vpack.c.bf16 %v292_v19, %v291_v13  ;;  %v284_v23 = vadd.f32 1.0, %v652_v17  ;;  %v303_v26 = vmul.f32 %v287_v15, %v207_v8  ;;  %v654_v55 = vpop.eup %653 }
  0xb2   :  { %v299_v35 = vmul.f32 %v283_v18, %v203_v52  ;;  %v282_v29 = vadd.f32 1.0, %v654_v55  ;;  %v656_v20 = vpop.eup %655 }
  0xb3   :  { %604 = vmatprep.mubr.msk.bf16.mxu0 %vm338_vm0, %v307_v33  ;;  %v300_v27 = vmul.f32 %v284_v23, %v204_v44  ;;  %v313_v38 = vpack.c.bf16 %v304_v24, %v303_v26  ;;  %v281_v39 = vadd.f32 1.0, %v656_v20 }
  0xb4   :  { %605 = vmatmul.mubr.msk.bf16.vlgmr.msra.gmra.mxu0 %vm338_vm0, %v308_v54  ;;  %v298_v40 = vmul.f32 %v282_v29, %v202_v32 }
  0xb5   :  { %v658_v36 = vpop.eup %657  ;;  %v311_v37 = vpack.c.bf16 %v300_v27, %v299_v35  ;;  %608 = vmatprep.mubr.msk.bf16.mxu0 %vm338_vm0, %v309_v22  ;;  %v297_v42 = vmul.f32 %v281_v39, %v201_v30 }
  0xb6   :  { %v290_v41 = vadd.f32 1.0, %v658_v36 }
  0xb7   :  { %612 = vmatprep.mubr.msk.bf16.mxu1 %vm338_vm0, %v311_v37  ;;  %v660_v45 = vpop.eup %659  ;;  %v310_v46 = vpack.c.bf16 %v298_v40, %v297_v42 }
  0xb8   :  { %613 = vmatmul.mubr.msk.bf16.vlgmr.msra.gmra.mxu1 %vm338_vm0, %v312_v31  ;;  %v289_v47 = vadd.f32 1.0, %v660_v45  ;;  %v306_v48 = vmul.f32 %v290_v41, %v210_v58 }
  0xb9   :  { %616 = vmatprep.mubr.msk.bf16.mxu1 %vm338_vm0, %v313_v38 }
  0xba   :  { %v305_v49 = vmul.f32 %v289_v47, %v209_v2 }
  0xbc   :  { %609 = vmatmul.mubr.msk.bf16.gmra.mxu0 %vm338_vm0, %v310_v46  ;;  %v314_v50 = vpack.c.bf16 %v306_v48, %v305_v49 }
  0xc0   :  { %617 = vmatmul.mubr.msk.bf16.gmra.mxu1 %vm338_vm0, %v314_v50 }
 0x174   :  { %v606_v51 = vpop.f32.mrf.mxu0 }
 0x175   :  { %v406_v52 = vadd.f32 %v606_v51, %v911_v6 }
 0x176   :  { %v397_v16 = vpop.f32.mrf.mxu0 }
 0x177   :  { %v576_v53 = vpack.c.bf16 %v406_v52, %v406_v52  ;;  %v398_v56 = vadd.f32 %v911_v6, %v397_v16 }
 0x178   :  { %v607_v57 = vpop.f32.mrf.mxu0  ;;  %v614_v59 = vpop.f32.mrf.mxu1 }
 0x179   :  { %527 = vst.msk [vmem:[%s998_s5 + $0x8] sm:$0xf] %vm524_vm1, %v576_v53  ;;  %v574_v60 = vpack.c.bf16 %v398_v56, %v398_v56  ;;  %v409_v25 = vadd.f32 %v607_v57, %v911_v6  ;;  %v438_v61 = vadd.f32 %v614_v59, %v911_v6 }
 0x17a   :  { %v400_v62 = vpop.f32.mrf.mxu0  ;;  %v429_v63 = vpop.f32.mrf.mxu1 }
 0x17b   :  { %525 = vst.msk [vmem:[%s998_s5] sm:$0xf] %vm524_vm1, %v574_v60  ;;  %v577_v0 = vpack.c.bf16 %v409_v25, %v409_v25  ;;  %v584_v43 = vpack.c.bf16 %v438_v61, %v438_v61  ;;  %v401_v1 = vadd.f32 %v911_v6, %v400_v62  ;;  %v430_v3 = vadd.f32 %v911_v6, %v429_v63 }
 0x17c   :  { %v615_v34 = vpop.f32.mrf.mxu1  ;;  %v610_v28 = vpop.f32.mrf.mxu0 }
 0x17d   :  { %528 = vst.msk [vmem:[%s998_s5 + $0xc] sm:$0xf] %vm524_vm1, %v577_v0  ;;  %535 = vst.msk [vmem:[%s998_s5 + $0x28] sm:$0xf] %vm524_vm1, %v584_v43  ;;  %v575_v4 = vpack.c.bf16 %v401_v1, %v401_v1  ;;  %v582_v44 = vpack.c.bf16 %v430_v3, %v430_v3  ;;  %v441_v5 = vadd.f32 %v615_v34, %v911_v6 }
 0x17e   :  { %v422_v11 = vadd.f32 %v610_v28, %v911_v6  ;;  %v432_v12 = vpop.f32.mrf.mxu1  ;;  %v413_v7 = vpop.f32.mrf.mxu0 }
 0x17f   :  { %526 = vst.msk [vmem:[%s998_s5 + $0x4] sm:$0xf] %vm524_vm1, %v575_v4  ;;  %533 = vst.msk [vmem:[%s998_s5 + $0x20] sm:$0xf] %vm524_vm1, %v582_v44  ;;  %v585_v8 = vpack.c.bf16 %v441_v5, %v441_v5  ;;  %v433_v9 = vadd.f32 %v911_v6, %v432_v12  ;;  %v414_v13 = vadd.f32 %v911_v6, %v413_v7 }
 0x180   :  { %v580_v10 = vpack.c.bf16 %v422_v11, %v422_v11  ;;  %v611_v19 = vpop.f32.mrf.mxu0  ;;  %v618_v14 = vpop.f32.mrf.mxu1 }
 0x181   :  { %536 = vst.msk [vmem:[%s998_s5 + $0x2c] sm:$0xf] %vm524_vm1, %v585_v8  ;;  %v583_v15 = vpack.c.bf16 %v433_v9, %v433_v9  ;;  %v578_v17 = vpack.c.bf16 %v414_v13, %v414_v13  ;;  %v425_v18 = vadd.f32 %v611_v19, %v911_v6  ;;  %v454_v54 = vadd.f32 %v618_v14, %v911_v6 }
 0x182   :  { %531 = vst.msk [vmem:[%s998_s5 + $0x18] sm:$0xf] %vm524_vm1, %v580_v10  ;;  %v416_v21 = vpop.f32.mrf.mxu0  ;;  %v445_v22 = vpop.f32.mrf.mxu1 }
 0x183   :  { %534 = vst.msk [vmem:[%s998_s5 + $0x24] sm:$0xf] %vm524_vm1, %v583_v15  ;;  %529 = vst.msk [vmem:[%s998_s5 + $0x10] sm:$0xf] %vm524_vm1, %v578_v17  ;;  %v581_v33 = vpack.c.bf16 %v425_v18, %v425_v18  ;;  %v588_v23 = vpack.c.bf16 %v454_v54, %v454_v54  ;;  %v417_v26 = vadd.f32 %v911_v6, %v416_v21 }
 0x184   :  { %v446_v24 = vadd.f32 %v911_v6, %v445_v22  ;;  %v619_v55 = vpop.f32.mrf.mxu1 }
 0x185   :  { %532 = vst.msk [vmem:[%s998_s5 + $0x1c] sm:$0xf] %vm524_vm1, %v581_v33  ;;  %539 = vst.msk [vmem:[%s998_s5 + $0x38] sm:$0xf] %vm524_vm1, %v588_v23  ;;  %v579_v32 = vpack.c.bf16 %v417_v26, %v417_v26  ;;  %v457_v27 = vadd.f32 %v619_v55, %v911_v6 }
 0x186   :  { %v586_v35 = vpack.c.bf16 %v446_v24, %v446_v24  ;;  %v448_v29 = vpop.f32.mrf.mxu1 }
 0x187   :  { %530 = vst.msk [vmem:[%s998_s5 + $0x14] sm:$0xf] %vm524_vm1, %v579_v32  ;;  %v589_v20 = vpack.c.bf16 %v457_v27, %v457_v27  ;;  %v449_v30 = vadd.f32 %v911_v6, %v448_v29 }
 0x188   :  { %537 = vst.msk [vmem:[%s998_s5 + $0x30] sm:$0xf] %vm524_vm1, %v586_v35 }
 0x189   :  { %540 = vst.msk [vmem:[%s998_s5 + $0x3c] sm:$0xf] %vm524_vm1, %v589_v20  ;;  %v587_v31 = vpack.c.bf16 %v449_v30, %v449_v30 }
 0x18b   :  { %538 = vst.msk [vmem:[%s998_s5 + $0x34] sm:$0xf] %vm524_vm1, %v587_v31 }

</bundles_post_ra>
